<compile_context>
chip_gen: v7x
topology: tpu7x:2x2x1
jax: 0.10.0
libtpu: 0.0.40
codegen_flags: <defaults>
</compile_context>

<pallas_src>
import functools

import jax
import jax.numpy as jnp
from jax.experimental import pallas as pl
from jax.experimental.pallas import tpu as pltpu


# ---------------------------------------------------------------------------
# VMEM budget helpers (per-generation clamp)
# ---------------------------------------------------------------------------

def _vmem_capacity_bytes():
    try:
        return int(pltpu.get_tpu_info().vmem_capacity_bytes)
    except Exception:
        return 64 * 1024 * 1024          # conservative: v7x per-TC VMEM


def _vmem_limit(work_bytes):
    cap = (_vmem_capacity_bytes() * 3) // 4          # leave compiler headroom
    return int(min(max(32 * 1024 * 1024, 2 * work_bytes), cap))


# ---------------------------------------------------------------------------
# Kernel 1: fused softmax + pairwise-L1 (cdist) for one row block of p_s
# ---------------------------------------------------------------------------

def _cdist_kernel(ys_ref, yt_ref, w_ref, *, inv_T, cb, transposed):
    """W[block, :] = cdist_L1(softmax(ys/T)[block], softmax(yt/T))."""
    tq, C = ys_ref.shape
    B = w_ref.shape[-1]

    def softmax_last(z):
        z = z.astype(jnp.float32) * inv_T
        m = jnp.max(z, axis=-1, keepdims=True)
        e = jnp.exp(z - m)
        return e / jnp.sum(e, axis=-1, keepdims=True)

    p_s = softmax_last(ys_ref[...])                                  # (tq, C)
    acc = jnp.zeros((tq, B), jnp.float32)

    if transposed:
        # yt_ref holds y_t^T (C, B): softmax over the class axis (axis 0) so
        # B stays on the lane axis; C < 128 here, so accumulate one class at a
        # time into the lane-dense (tq, B) accumulator (VPU only, no lane
        # reduce, no 3-D broadcast temp).
        zt = yt_ref[...].astype(jnp.float32) * inv_T                 # (C, B)
        mt = jnp.max(zt, axis=0, keepdims=True)
        et = jnp.exp(zt - mt)
        p_tT = et / jnp.sum(et, axis=0, keepdims=True)               # (C, B)
        for c in range(C):
            acc = acc + jnp.abs(p_s[:, c:c + 1] - p_tT[c:c + 1, :])
    else:
        # yt_ref is y_t (B, C) with C on lanes; chunk over C so the
        # (tq, B, cb) broadcast temp stays bounded in VMEM (v7x-safe).
        p_t = softmax_last(yt_ref[...])                              # (B, C)
        for c0 in range(0, C, cb):
            c1 = min(C, c0 + cb)
            acc = acc + jnp.sum(
                jnp.abs(p_s[:, None, c0:c1] - p_t[None, :, c0:c1]), axis=-1)

    w_ref[...] = acc


def _pairwise_l1(y_s, y_t, *, T):
    B, C = y_s.shape
    transposed = (C < 128) and (B > C)
    tq = B if B <= 128 else 128
    n_blocks = pl.cdiv(B, tq)

    if transposed:
        yt_in = y_t.T                            # (C, B): B on lanes in-kernel
        yt_block = (C, B)
        cb = C                                   # unused on this path
    else:
        yt_in = y_t
        yt_block = (B, C)
        # Keep the (tq, B, cb) temp around <= 8 MiB, but bound the number of
        # statically unrolled C-chunks.
        cb = min(C, max(8, (8 * 1024 * 1024) // (4 * tq * B)))
        cb = max(cb, pl.cdiv(C, 64))

    kernel = functools.partial(_cdist_kernel, inv_T=1.0 / float(T),
                               cb=int(cb), transposed=transposed)

    work = 4 * (3 * tq * C + 3 * B * C + 5 * tq * B
                + (0 if transposed else tq * B * cb))
    # TODO(synk): for very large B*C (teacher probs not fitting VMEM at once),
    # p_t would also need to be blocked with a two-pass softmax.
    return pl.pallas_call(
        kernel,
        out_shape=jax.ShapeDtypeStruct((B, B), jnp.float32),
        grid=(n_blocks,),
        in_specs=[pl.BlockSpec((tq, C), lambda i: (i, 0)),
                  pl.BlockSpec(yt_block, lambda i: (0, 0))],
        out_specs=pl.BlockSpec((tq, B), lambda i: (i, 0)),
        compiler_params=pltpu.CompilerParams(
            dimension_semantics=("parallel",),
            vmem_limit_bytes=_vmem_limit(work)),
    )(y_s, yt_in)


# ---------------------------------------------------------------------------
# Kernel 2: exp(-W/eps) + scaling-vector Sinkhorn iterations + loss
# ---------------------------------------------------------------------------

def _sinkhorn_kernel(w_ref, out_ref, *, epsilon, n_iters, scale):
    w = w_ref[...]                                    # (B, B) f32, resident
    B = w.shape[0]
    k = jnp.exp(w * (-1.0 / epsilon))                 # K = exp(-W / eps)
    kt = k.T                                          # transposed once, reused

    a = jnp.ones((1, B), jnp.float32)                 # row-normalization factors
    b = jnp.ones((1, B), jnp.float32)                 # col-normalization factors
    # Reference loop: x /= rowsum(x); x /= colsum(x)  (20x).  Equivalent to
    # P = diag(a) K diag(b) with the factor updates below; each step is two
    # (1,B)x(B,B) MXU matvecs + 2B reciprocals instead of 2*B^2 divides.
    for _ in range(n_iters):                          # statically unrolled
        a = 1.0 / jnp.dot(b, kt, preferred_element_type=jnp.float32)
        b = 1.0 / jnp.dot(a, k, preferred_element_type=jnp.float32)

    # loss = scale * sum(P * W) = scale * a @ (K*W) @ b^T   (Hadamard done once)
    t = jnp.dot(a, k * w, preferred_element_type=jnp.float32)        # (1, B)
    out_ref[...] = scale * jnp.sum(t * b, keepdims=True)             # (1, 1)


# ---------------------------------------------------------------------------
# Public wrapper: Sinkhorn(T).forward(y_s, y_t)   (module hard-codes T = 2)
# ---------------------------------------------------------------------------

def sinkhorn_loss(y_s, y_t, *, T=2.0, epsilon=0.1, n_iters=20, scale=0.001):
    assert y_s.shape == y_t.shape and y_s.ndim == 2
    B, _ = y_s.shape

    w = _pairwise_l1(y_s, y_t, T=T)                   # (B, B) L1 distances

    kernel = functools.partial(_sinkhorn_kernel, epsilon=float(epsilon),
                               n_iters=int(n_iters), scale=float(scale))
    work = 4 * (6 * B * B + 8 * B)
    out = pl.pallas_call(
        kernel,
        out_shape=jax.ShapeDtypeStruct((1, 1), jnp.float32),
        in_specs=[pl.BlockSpec(memory_space=pltpu.MemorySpace.VMEM)],
        out_specs=pl.BlockSpec(memory_space=pltpu.MemorySpace.VMEM),
        compiler_params=pltpu.CompilerParams(vmem_limit_bytes=_vmem_limit(work)),
    )(w)
    return out[0, 0]


# ---------------------------------------------------------------------------
# Pure-JAX reference (mirrors the PyTorch module) for correctness checking
# ---------------------------------------------------------------------------

def sinkhorn_loss_ref(y_s, y_t, T=2.0, epsilon=0.1, n_iters=20, scale=0.001):
    p_s = jax.nn.softmax(y_s / T, axis=1)
    p_t = jax.nn.softmax(y_t / T, axis=1)
    w = jnp.sum(jnp.abs(p_s[:, None, :] - p_t[None, :, :]), axis=-1)
    p = jnp.exp(-w / epsilon)
    for _ in range(n_iters):
        p = p / jnp.sum(p, axis=1, keepdims=True)
        p = p / jnp.sum(p, axis=0, keepdims=True)
    return scale * jnp.sum(p * w)


# ---------------------------------------------------------------------------
# Demo
# ---------------------------------------------------------------------------

if __name__ == "__main__":
    loss_fn = jax.jit(sinkhorn_loss)
    key = jax.random.PRNGKey(0)
    # (8, 32): single-block, C-on-lanes path.
    # (160, 16): multi-block parallel grid (partial last block) + lane-dense
    #            transposed cdist path.
    for B, C in [(8, 32), (160, 16)]:
        key, k_s, k_t = jax.random.split(key, 3)
        y_s = jax.random.normal(k_s, (B, C), dtype=jnp.float32)
        y_t = jax.random.normal(k_t, (B, C), dtype=jnp.float32)

        loss = loss_fn(y_s, y_t)
        jax.block_until_ready(loss)

        ref = sinkhorn_loss_ref(y_s, y_t)
        assert loss.shape == () and bool(jnp.isfinite(loss))
        # Tolerance leaves room for MXU pass-precision / summation-order
        # differences; in practice the kernel matches the f32 reference to
        # ~1e-6 relative.
        assert jnp.allclose(loss, ref, rtol=2e-2, atol=1e-6), \
            (B, C, float(loss), float(ref))
    print("KERNEL_OK")
</pallas_src>

<mosaic_0001>
module attributes {stable_mosaic.version = 11 : i64} {
  func.func @_cdist_kernel(%arg0: i32, %arg1: memref<8x32xf32, #tpu.memory_space<vmem>>, %arg2: memref<8x32xf32, #tpu.memory_space<vmem>>, %arg3: memref<8x8xf32, #tpu.memory_space<vmem>>) attributes {dimension_semantics = [#tpu.dimension_semantics<parallel>], iteration_bounds = array<i64: 1>, scalar_prefetch = 0 : i64, scratch_operands = 0 : i64, tpu.core_type = #tpu.core_type<tc>, window_params = [{transform_indices = @transform_0, window_bounds = array<i64: 8, 32>}, {pipeline_mode = #tpu.pipeline_mode<synchronous>, transform_indices = @transform_1, window_bounds = array<i64: 8, 32>}, {transform_indices = @transform_2, window_bounds = array<i64: 8, 8>}]} {
    %c0 = arith.constant 0 : index
    %c0_0 = arith.constant 0 : index
    %0 = vector.load %arg1[%c0, %c0_0] : memref<8x32xf32, #tpu.memory_space<vmem>>, vector<8x32xf32>
    %cst = arith.constant 5.000000e-01 : f32
    %1 = vector.broadcast %cst : f32 to vector<8x32xf32>
    %2 = arith.mulf %0, %1 : vector<8x32xf32>
    %cst_1 = arith.constant dense<0xFF800000> : vector<8xf32>
    %3 = vector.multi_reduction <maximumf>, %2, %cst_1 [1] : vector<8x32xf32> to vector<8xf32>
    %4 = vector.shape_cast %3 : vector<8xf32> to vector<8x1xf32>
    %5 = vector.broadcast %4 : vector<8x1xf32> to vector<8x32xf32>
    %6 = arith.subf %2, %5 : vector<8x32xf32>
    %7 = math.exp %6 : vector<8x32xf32>
    %cst_2 = arith.constant dense<0.000000e+00> : vector<8xf32>
    %8 = vector.multi_reduction <add>, %7, %cst_2 [1] : vector<8x32xf32> to vector<8xf32>
    %9 = vector.shape_cast %8 : vector<8xf32> to vector<8x1xf32>
    %10 = vector.broadcast %9 : vector<8x1xf32> to vector<8x32xf32>
    %11 = arith.divf %7, %10 : vector<8x32xf32>
    %cst_3 = arith.constant 0.000000e+00 : f32
    %12 = vector.broadcast %cst_3 : f32 to vector<8x8xf32>
    %c0_4 = arith.constant 0 : index
    %c0_5 = arith.constant 0 : index
    %13 = vector.load %arg2[%c0_4, %c0_5] : memref<8x32xf32, #tpu.memory_space<vmem>>, vector<8x32xf32>
    %cst_6 = arith.constant 5.000000e-01 : f32
    %14 = vector.broadcast %cst_6 : f32 to vector<8x32xf32>
    %15 = arith.mulf %13, %14 : vector<8x32xf32>
    %cst_7 = arith.constant dense<0xFF800000> : vector<8xf32>
    %16 = vector.multi_reduction <maximumf>, %15, %cst_7 [1] : vector<8x32xf32> to vector<8xf32>
    %17 = vector.shape_cast %16 : vector<8xf32> to vector<8x1xf32>
    %18 = vector.broadcast %17 : vector<8x1xf32> to vector<8x32xf32>
    %19 = arith.subf %15, %18 : vector<8x32xf32>
    %20 = math.exp %19 : vector<8x32xf32>
    %cst_8 = arith.constant dense<0.000000e+00> : vector<8xf32>
    %21 = vector.multi_reduction <add>, %20, %cst_8 [1] : vector<8x32xf32> to vector<8xf32>
    %22 = vector.shape_cast %21 : vector<8xf32> to vector<8x1xf32>
    %23 = vector.broadcast %22 : vector<8x1xf32> to vector<8x32xf32>
    %24 = arith.divf %20, %23 : vector<8x32xf32>
    %25 = vector.shape_cast %11 : vector<8x32xf32> to vector<8x1x32xf32>
    %26 = vector.shape_cast %24 : vector<8x32xf32> to vector<1x8x32xf32>
    %27 = vector.broadcast %25 : vector<8x1x32xf32> to vector<8x8x32xf32>
    %28 = vector.broadcast %26 : vector<1x8x32xf32> to vector<8x8x32xf32>
    %29 = arith.subf %27, %28 : vector<8x8x32xf32>
    %30 = math.absf %29 : vector<8x8x32xf32>
    %cst_9 = arith.constant dense<0.000000e+00> : vector<8x8xf32>
    %31 = vector.multi_reduction <add>, %30, %cst_9 [2] : vector<8x8x32xf32> to vector<8x8xf32>
    %32 = arith.addf %12, %31 : vector<8x8xf32>
    %c0_10 = arith.constant 0 : index
    %c0_11 = arith.constant 0 : index
    %33 = vector.load %arg3[%c0_10, %c0_11] : memref<8x8xf32, #tpu.memory_space<vmem>>, vector<8x8xf32>
    tpu.vector_store %arg3[%c0_10, %c0_11], %32 {strides = array<i32>} : memref<8x8xf32, #tpu.memory_space<vmem>>, vector<8x8xf32>,
    return
  }
  func.func @transform_0(%arg0: i32) -> (i32, i32) {
    %c0_i32 = arith.constant 0 : i32
    %c0_i32_0 = arith.constant 0 : i32
    return %arg0, %c0_i32 : i32, i32
  }
  func.func @transform_1(%arg0: i32) -> (i32, i32) {
    %c0_i32 = arith.constant 0 : i32
    %c0_i32_0 = arith.constant 0 : i32
    %c0_i32_1 = arith.constant 0 : i32
    return %c0_i32, %c0_i32_0 : i32, i32
  }
  func.func @transform_2(%arg0: i32) -> (i32, i32) {
    %c0_i32 = arith.constant 0 : i32
    %c0_i32_0 = arith.constant 0 : i32
    return %arg0, %c0_i32 : i32, i32
  }
}

module attributes {stable_mosaic.version = 11 : i64} {
  func.func @_sinkhorn_kernel(%arg0: memref<8x8xf32, #tpu.memory_space<vmem>>, %arg1: memref<1x1xf32, #tpu.memory_space<vmem>>) attributes {dimension_semantics = [], scalar_prefetch = 0 : i64, scratch_operands = 0 : i64, tpu.core_type = #tpu.core_type<tc>} {
    %c0 = arith.constant 0 : index
    %c0_0 = arith.constant 0 : index
    %0 = vector.load %arg0[%c0, %c0_0] : memref<8x8xf32, #tpu.memory_space<vmem>>, vector<8x8xf32>
    %cst = arith.constant -1.000000e+01 : f32
    %1 = vector.broadcast %cst : f32 to vector<8x8xf32>
    %2 = arith.mulf %0, %1 : vector<8x8xf32>
    %3 = math.exp %2 : vector<8x8xf32>
    %4 = tpu.transpose %3, [1, 0] : vector<8x8xf32> -> vector<8x8xf32>
    %cst_1 = arith.constant 1.000000e+00 : f32
    %5 = vector.broadcast %cst_1 : f32 to vector<1x8xf32>
    %cst_2 = arith.constant dense<0.000000e+00> : vector<1x8xf32>
    %6 = tpu.matmul %5, %4, %cst_2 {dimension_numbers = #tpu.dot_dimension_numbers<[1], [0], [0], [1], [0, 0, 1, 1], [], []>} : vector<1x8xf32>, vector<8x8xf32>, vector<1x8xf32> -> vector<1x8xf32>
    %cst_3 = arith.constant 1.000000e+00 : f32
    %7 = vector.broadcast %cst_3 : f32 to vector<1x8xf32>
    %8 = arith.divf %7, %6 : vector<1x8xf32>
    %cst_4 = arith.constant dense<0.000000e+00> : vector<1x8xf32>
    %9 = tpu.matmul %8, %3, %cst_4 {dimension_numbers = #tpu.dot_dimension_numbers<[1], [0], [0], [1], [0, 0, 1, 1], [], []>} : vector<1x8xf32>, vector<8x8xf32>, vector<1x8xf32> -> vector<1x8xf32>
    %cst_5 = arith.constant 1.000000e+00 : f32
    %10 = vector.broadcast %cst_5 : f32 to vector<1x8xf32>
    %11 = arith.divf %10, %9 : vector<1x8xf32>
    %cst_6 = arith.constant dense<0.000000e+00> : vector<1x8xf32>
    %12 = tpu.matmul %11, %4, %cst_6 {dimension_numbers = #tpu.dot_dimension_numbers<[1], [0], [0], [1], [0, 0, 1, 1], [], []>} : vector<1x8xf32>, vector<8x8xf32>, vector<1x8xf32> -> vector<1x8xf32>
    %cst_7 = arith.constant 1.000000e+00 : f32
    %13 = vector.broadcast %cst_7 : f32 to vector<1x8xf32>
    %14 = arith.divf %13, %12 : vector<1x8xf32>
    %cst_8 = arith.constant dense<0.000000e+00> : vector<1x8xf32>
    %15 = tpu.matmul %14, %3, %cst_8 {dimension_numbers = #tpu.dot_dimension_numbers<[1], [0], [0], [1], [0, 0, 1, 1], [], []>} : vector<1x8xf32>, vector<8x8xf32>, vector<1x8xf32> -> vector<1x8xf32>
    %cst_9 = arith.constant 1.000000e+00 : f32
    %16 = vector.broadcast %cst_9 : f32 to vector<1x8xf32>
    %17 = arith.divf %16, %15 : vector<1x8xf32>
    %cst_10 = arith.constant dense<0.000000e+00> : vector<1x8xf32>
    %18 = tpu.matmul %17, %4, %cst_10 {dimension_numbers = #tpu.dot_dimension_numbers<[1], [0], [0], [1], [0, 0, 1, 1], [], []>} : vector<1x8xf32>, vector<8x8xf32>, vector<1x8xf32> -> vector<1x8xf32>
    %cst_11 = arith.constant 1.000000e+00 : f32
    %19 = vector.broadcast %cst_11 : f32 to vector<1x8xf32>
    %20 = arith.divf %19, %18 : vector<1x8xf32>
    %cst_12 = arith.constant dense<0.000000e+00> : vector<1x8xf32>
    %21 = tpu.matmul %20, %3, %cst_12 {dimension_numbers = #tpu.dot_dimension_numbers<[1], [0], [0], [1], [0, 0, 1, 1], [], []>} : vector<1x8xf32>, vector<8x8xf32>, vector<1x8xf32> -> vector<1x8xf32>
    %cst_13 = arith.constant 1.000000e+00 : f32
    %22 = vector.broadcast %cst_13 : f32 to vector<1x8xf32>
    %23 = arith.divf %22, %21 : vector<1x8xf32>
    %cst_14 = arith.constant dense<0.000000e+00> : vector<1x8xf32>
    %24 = tpu.matmul %23, %4, %cst_14 {dimension_numbers = #tpu.dot_dimension_numbers<[1], [0], [0], [1], [0, 0, 1, 1], [], []>} : vector<1x8xf32>, vector<8x8xf32>, vector<1x8xf32> -> vector<1x8xf32>
    %cst_15 = arith.constant 1.000000e+00 : f32
    %25 = vector.broadcast %cst_15 : f32 to vector<1x8xf32>
    %26 = arith.divf %25, %24 : vector<1x8xf32>
    %cst_16 = arith.constant dense<0.000000e+00> : vector<1x8xf32>
    %27 = tpu.matmul %26, %3, %cst_16 {dimension_numbers = #tpu.dot_dimension_numbers<[1], [0], [0], [1], [0, 0, 1, 1], [], []>} : vector<1x8xf32>, vector<8x8xf32>, vector<1x8xf32> -> vector<1x8xf32>
    %cst_17 = arith.constant 1.000000e+00 : f32
    %28 = vector.broadcast %cst_17 : f32 to vector<1x8xf32>
    %29 = arith.divf %28, %27 : vector<1x8xf32>
    %cst_18 = arith.constant dense<0.000000e+00> : vector<1x8xf32>
    %30 = tpu.matmul %29, %4, %cst_18 {dimension_numbers = #tpu.dot_dimension_numbers<[1], [0], [0], [1], [0, 0, 1, 1], [], []>} : vector<1x8xf32>, vector<8x8xf32>, vector<1x8xf32> -> vector<1x8xf32>
    %cst_19 = arith.constant 1.000000e+00 : f32
    %31 = vector.broadcast %cst_19 : f32 to vector<1x8xf32>
    %32 = arith.divf %31, %30 : vector<1x8xf32>
    %cst_20 = arith.constant dense<0.000000e+00> : vector<1x8xf32>
    %33 = tpu.matmul %32, %3, %cst_20 {dimension_numbers = #tpu.dot_dimension_numbers<[1], [0], [0], [1], [0, 0, 1, 1], [], []>} : vector<1x8xf32>, vector<8x8xf32>, vector<1x8xf32> -> vector<1x8xf32>
    %cst_21 = arith.constant 1.000000e+00 : f32
    %34 = vector.broadcast %cst_21 : f32 to vector<1x8xf32>
    %35 = arith.divf %34, %33 : vector<1x8xf32>
    %cst_22 = arith.constant dense<0.000000e+00> : vector<1x8xf32>
    %36 = tpu.matmul %35, %4, %cst_22 {dimension_numbers = #tpu.dot_dimension_numbers<[1], [0], [0], [1], [0, 0, 1, 1], [], []>} : vector<1x8xf32>, vector<8x8xf32>, vector<1x8xf32> -> vector<1x8xf32>
    %cst_23 = arith.constant 1.000000e+00 : f32
    %37 = vector.broadcast %cst_23 : f32 to vector<1x8xf32>
    %38 = arith.divf %37, %36 : vector<1x8xf32>
    %cst_24 = arith.constant dense<0.000000e+00> : vector<1x8xf32>
    %39 = tpu.matmul %38, %3, %cst_24 {dimension_numbers = #tpu.dot_dimension_numbers<[1], [0], [0], [1], [0, 0, 1, 1], [], []>} : vector<1x8xf32>, vector<8x8xf32>, vector<1x8xf32> -> vector<1x8xf32>
    %cst_25 = arith.constant 1.000000e+00 : f32
    %40 = vector.broadcast %cst_25 : f32 to vector<1x8xf32>
    %41 = arith.divf %40, %39 : vector<1x8xf32>
    %cst_26 = arith.constant dense<0.000000e+00> : vector<1x8xf32>
    %42 = tpu.matmul %41, %4, %cst_26 {dimension_numbers = #tpu.dot_dimension_numbers<[1], [0], [0], [1], [0, 0, 1, 1], [], []>} : vector<1x8xf32>, vector<8x8xf32>, vector<1x8xf32> -> vector<1x8xf32>
    %cst_27 = arith.constant 1.000000e+00 : f32
    %43 = vector.broadcast %cst_27 : f32 to vector<1x8xf32>
    %44 = arith.divf %43, %42 : vector<1x8xf32>
    %cst_28 = arith.constant dense<0.000000e+00> : vector<1x8xf32>
    %45 = tpu.matmul %44, %3, %cst_28 {dimension_numbers = #tpu.dot_dimension_numbers<[1], [0], [0], [1], [0, 0, 1, 1], [], []>} : vector<1x8xf32>, vector<8x8xf32>, vector<1x8xf32> -> vector<1x8xf32>
    %cst_29 = arith.constant 1.000000e+00 : f32
    %46 = vector.broadcast %cst_29 : f32 to vector<1x8xf32>
    %47 = arith.divf %46, %45 : vector<1x8xf32>
    %cst_30 = arith.constant dense<0.000000e+00> : vector<1x8xf32>
    %48 = tpu.matmul %47, %4, %cst_30 {dimension_numbers = #tpu.dot_dimension_numbers<[1], [0], [0], [1], [0, 0, 1, 1], [], []>} : vector<1x8xf32>, vector<8x8xf32>, vector<1x8xf32> -> vector<1x8xf32>
    %cst_31 = arith.constant 1.000000e+00 : f32
    %49 = vector.broadcast %cst_31 : f32 to vector<1x8xf32>
    %50 = arith.divf %49, %48 : vector<1x8xf32>
    %cst_32 = arith.constant dense<0.000000e+00> : vector<1x8xf32>
    %51 = tpu.matmul %50, %3, %cst_32 {dimension_numbers = #tpu.dot_dimension_numbers<[1], [0], [0], [1], [0, 0, 1, 1], [], []>} : vector<1x8xf32>, vector<8x8xf32>, vector<1x8xf32> -> vector<1x8xf32>
    %cst_33 = arith.constant 1.000000e+00 : f32
    %52 = vector.broadcast %cst_33 : f32 to vector<1x8xf32>
    %53 = arith.divf %52, %51 : vector<1x8xf32>
    %cst_34 = arith.constant dense<0.000000e+00> : vector<1x8xf32>
    %54 = tpu.matmul %53, %4, %cst_34 {dimension_numbers = #tpu.dot_dimension_numbers<[1], [0], [0], [1], [0, 0, 1, 1], [], []>} : vector<1x8xf32>, vector<8x8xf32>, vector<1x8xf32> -> vector<1x8xf32>
    %cst_35 = arith.constant 1.000000e+00 : f32
    %55 = vector.broadcast %cst_35 : f32 to vector<1x8xf32>
    %56 = arith.divf %55, %54 : vector<1x8xf32>
    %cst_36 = arith.constant dense<0.000000e+00> : vector<1x8xf32>
    %57 = tpu.matmul %56, %3, %cst_36 {dimension_numbers = #tpu.dot_dimension_numbers<[1], [0], [0], [1], [0, 0, 1, 1], [], []>} : vector<1x8xf32>, vector<8x8xf32>, vector<1x8xf32> -> vector<1x8xf32>
    %cst_37 = arith.constant 1.000000e+00 : f32
    %58 = vector.broadcast %cst_37 : f32 to vector<1x8xf32>
    %59 = arith.divf %58, %57 : vector<1x8xf32>
    %cst_38 = arith.constant dense<0.000000e+00> : vector<1x8xf32>
    %60 = tpu.matmul %59, %4, %cst_38 {dimension_numbers = #tpu.dot_dimension_numbers<[1], [0], [0], [1], [0, 0, 1, 1], [], []>} : vector<1x8xf32>, vector<8x8xf32>, vector<1x8xf32> -> vector<1x8xf32>
    %cst_39 = arith.constant 1.000000e+00 : f32
    %61 = vector.broadcast %cst_39 : f32 to vector<1x8xf32>
    %62 = arith.divf %61, %60 : vector<1x8xf32>
    %cst_40 = arith.constant dense<0.000000e+00> : vector<1x8xf32>
    %63 = tpu.matmul %62, %3, %cst_40 {dimension_numbers = #tpu.dot_dimension_numbers<[1], [0], [0], [1], [0, 0, 1, 1], [], []>} : vector<1x8xf32>, vector<8x8xf32>, vector<1x8xf32> -> vector<1x8xf32>
    %cst_41 = arith.constant 1.000000e+00 : f32
    %64 = vector.broadcast %cst_41 : f32 to vector<1x8xf32>
    %65 = arith.divf %64, %63 : vector<1x8xf32>
    %cst_42 = arith.constant dense<0.000000e+00> : vector<1x8xf32>
    %66 = tpu.matmul %65, %4, %cst_42 {dimension_numbers = #tpu.dot_dimension_numbers<[1], [0], [0], [1], [0, 0, 1, 1], [], []>} : vector<1x8xf32>, vector<8x8xf32>, vector<1x8xf32> -> vector<1x8xf32>
    %cst_43 = arith.constant 1.000000e+00 : f32
    %67 = vector.broadcast %cst_43 : f32 to vector<1x8xf32>
    %68 = arith.divf %67, %66 : vector<1x8xf32>
    %cst_44 = arith.constant dense<0.000000e+00> : vector<1x8xf32>
    %69 = tpu.matmul %68, %3, %cst_44 {dimension_numbers = #tpu.dot_dimension_numbers<[1], [0], [0], [1], [0, 0, 1, 1], [], []>} : vector<1x8xf32>, vector<8x8xf32>, vector<1x8xf32> -> vector<1x8xf32>
    %cst_45 = arith.constant 1.000000e+00 : f32
    %70 = vector.broadcast %cst_45 : f32 to vector<1x8xf32>
    %71 = arith.divf %70, %69 : vector<1x8xf32>
    %cst_46 = arith.constant dense<0.000000e+00> : vector<1x8xf32>
    %72 = tpu.matmul %71, %4, %cst_46 {dimension_numbers = #tpu.dot_dimension_numbers<[1], [0], [0], [1], [0, 0, 1, 1], [], []>} : vector<1x8xf32>, vector<8x8xf32>, vector<1x8xf32> -> vector<1x8xf32>
    %cst_47 = arith.constant 1.000000e+00 : f32
    %73 = vector.broadcast %cst_47 : f32 to vector<1x8xf32>
    %74 = arith.divf %73, %72 : vector<1x8xf32>
    %cst_48 = arith.constant dense<0.000000e+00> : vector<1x8xf32>
    %75 = tpu.matmul %74, %3, %cst_48 {dimension_numbers = #tpu.dot_dimension_numbers<[1], [0], [0], [1], [0, 0, 1, 1], [], []>} : vector<1x8xf32>, vector<8x8xf32>, vector<1x8xf32> -> vector<1x8xf32>
    %cst_49 = arith.constant 1.000000e+00 : f32
    %76 = vector.broadcast %cst_49 : f32 to vector<1x8xf32>
    %77 = arith.divf %76, %75 : vector<1x8xf32>
    %cst_50 = arith.constant dense<0.000000e+00> : vector<1x8xf32>
    %78 = tpu.matmul %77, %4, %cst_50 {dimension_numbers = #tpu.dot_dimension_numbers<[1], [0], [0], [1], [0, 0, 1, 1], [], []>} : vector<1x8xf32>, vector<8x8xf32>, vector<1x8xf32> -> vector<1x8xf32>
    %cst_51 = arith.constant 1.000000e+00 : f32
    %79 = vector.broadcast %cst_51 : f32 to vector<1x8xf32>
    %80 = arith.divf %79, %78 : vector<1x8xf32>
    %cst_52 = arith.constant dense<0.000000e+00> : vector<1x8xf32>
    %81 = tpu.matmul %80, %3, %cst_52 {dimension_numbers = #tpu.dot_dimension_numbers<[1], [0], [0], [1], [0, 0, 1, 1], [], []>} : vector<1x8xf32>, vector<8x8xf32>, vector<1x8xf32> -> vector<1x8xf32>
    %cst_53 = arith.constant 1.000000e+00 : f32
    %82 = vector.broadcast %cst_53 : f32 to vector<1x8xf32>
    %83 = arith.divf %82, %81 : vector<1x8xf32>
    %cst_54 = arith.constant dense<0.000000e+00> : vector<1x8xf32>
    %84 = tpu.matmul %83, %4, %cst_54 {dimension_numbers = #tpu.dot_dimension_numbers<[1], [0], [0], [1], [0, 0, 1, 1], [], []>} : vector<1x8xf32>, vector<8x8xf32>, vector<1x8xf32> -> vector<1x8xf32>
    %cst_55 = arith.constant 1.000000e+00 : f32
    %85 = vector.broadcast %cst_55 : f32 to vector<1x8xf32>
    %86 = arith.divf %85, %84 : vector<1x8xf32>
    %cst_56 = arith.constant dense<0.000000e+00> : vector<1x8xf32>
    %87 = tpu.matmul %86, %3, %cst_56 {dimension_numbers = #tpu.dot_dimension_numbers<[1], [0], [0], [1], [0, 0, 1, 1], [], []>} : vector<1x8xf32>, vector<8x8xf32>, vector<1x8xf32> -> vector<1x8xf32>
    %cst_57 = arith.constant 1.000000e+00 : f32
    %88 = vector.broadcast %cst_57 : f32 to vector<1x8xf32>
    %89 = arith.divf %88, %87 : vector<1x8xf32>
    %cst_58 = arith.constant dense<0.000000e+00> : vector<1x8xf32>
    %90 = tpu.matmul %89, %4, %cst_58 {dimension_numbers = #tpu.dot_dimension_numbers<[1], [0], [0], [1], [0, 0, 1, 1], [], []>} : vector<1x8xf32>, vector<8x8xf32>, vector<1x8xf32> -> vector<1x8xf32>
    %cst_59 = arith.constant 1.000000e+00 : f32
    %91 = vector.broadcast %cst_59 : f32 to vector<1x8xf32>
    %92 = arith.divf %91, %90 : vector<1x8xf32>
    %cst_60 = arith.constant dense<0.000000e+00> : vector<1x8xf32>
    %93 = tpu.matmul %92, %3, %cst_60 {dimension_numbers = #tpu.dot_dimension_numbers<[1], [0], [0], [1], [0, 0, 1, 1], [], []>} : vector<1x8xf32>, vector<8x8xf32>, vector<1x8xf32> -> vector<1x8xf32>
    %cst_61 = arith.constant 1.000000e+00 : f32
    %94 = vector.broadcast %cst_61 : f32 to vector<1x8xf32>
    %95 = arith.divf %94, %93 : vector<1x8xf32>
    %cst_62 = arith.constant dense<0.000000e+00> : vector<1x8xf32>
    %96 = tpu.matmul %95, %4, %cst_62 {dimension_numbers = #tpu.dot_dimension_numbers<[1], [0], [0], [1], [0, 0, 1, 1], [], []>} : vector<1x8xf32>, vector<8x8xf32>, vector<1x8xf32> -> vector<1x8xf32>
    %cst_63 = arith.constant 1.000000e+00 : f32
    %97 = vector.broadcast %cst_63 : f32 to vector<1x8xf32>
    %98 = arith.divf %97, %96 : vector<1x8xf32>
    %cst_64 = arith.constant dense<0.000000e+00> : vector<1x8xf32>
    %99 = tpu.matmul %98, %3, %cst_64 {dimension_numbers = #tpu.dot_dimension_numbers<[1], [0], [0], [1], [0, 0, 1, 1], [], []>} : vector<1x8xf32>, vector<8x8xf32>, vector<1x8xf32> -> vector<1x8xf32>
    %cst_65 = arith.constant 1.000000e+00 : f32
    %100 = vector.broadcast %cst_65 : f32 to vector<1x8xf32>
    %101 = arith.divf %100, %99 : vector<1x8xf32>
    %cst_66 = arith.constant dense<0.000000e+00> : vector<1x8xf32>
    %102 = tpu.matmul %101, %4, %cst_66 {dimension_numbers = #tpu.dot_dimension_numbers<[1], [0], [0], [1], [0, 0, 1, 1], [], []>} : vector<1x8xf32>, vector<8x8xf32>, vector<1x8xf32> -> vector<1x8xf32>
    %cst_67 = arith.constant 1.000000e+00 : f32
    %103 = vector.broadcast %cst_67 : f32 to vector<1x8xf32>
    %104 = arith.divf %103, %102 : vector<1x8xf32>
    %cst_68 = arith.constant dense<0.000000e+00> : vector<1x8xf32>
    %105 = tpu.matmul %104, %3, %cst_68 {dimension_numbers = #tpu.dot_dimension_numbers<[1], [0], [0], [1], [0, 0, 1, 1], [], []>} : vector<1x8xf32>, vector<8x8xf32>, vector<1x8xf32> -> vector<1x8xf32>
    %cst_69 = arith.constant 1.000000e+00 : f32
    %106 = vector.broadcast %cst_69 : f32 to vector<1x8xf32>
    %107 = arith.divf %106, %105 : vector<1x8xf32>
    %cst_70 = arith.constant dense<0.000000e+00> : vector<1x8xf32>
    %108 = tpu.matmul %107, %4, %cst_70 {dimension_numbers = #tpu.dot_dimension_numbers<[1], [0], [0], [1], [0, 0, 1, 1], [], []>} : vector<1x8xf32>, vector<8x8xf32>, vector<1x8xf32> -> vector<1x8xf32>
    %cst_71 = arith.constant 1.000000e+00 : f32
    %109 = vector.broadcast %cst_71 : f32 to vector<1x8xf32>
    %110 = arith.divf %109, %108 : vector<1x8xf32>
    %cst_72 = arith.constant dense<0.000000e+00> : vector<1x8xf32>
    %111 = tpu.matmul %110, %3, %cst_72 {dimension_numbers = #tpu.dot_dimension_numbers<[1], [0], [0], [1], [0, 0, 1, 1], [], []>} : vector<1x8xf32>, vector<8x8xf32>, vector<1x8xf32> -> vector<1x8xf32>
    %cst_73 = arith.constant 1.000000e+00 : f32
    %112 = vector.broadcast %cst_73 : f32 to vector<1x8xf32>
    %113 = arith.divf %112, %111 : vector<1x8xf32>
    %cst_74 = arith.constant dense<0.000000e+00> : vector<1x8xf32>
    %114 = tpu.matmul %113, %4, %cst_74 {dimension_numbers = #tpu.dot_dimension_numbers<[1], [0], [0], [1], [0, 0, 1, 1], [], []>} : vector<1x8xf32>, vector<8x8xf32>, vector<1x8xf32> -> vector<1x8xf32>
    %cst_75 = arith.constant 1.000000e+00 : f32
    %115 = vector.broadcast %cst_75 : f32 to vector<1x8xf32>
    %116 = arith.divf %115, %114 : vector<1x8xf32>
    %cst_76 = arith.constant dense<0.000000e+00> : vector<1x8xf32>
    %117 = tpu.matmul %116, %3, %cst_76 {dimension_numbers = #tpu.dot_dimension_numbers<[1], [0], [0], [1], [0, 0, 1, 1], [], []>} : vector<1x8xf32>, vector<8x8xf32>, vector<1x8xf32> -> vector<1x8xf32>
    %cst_77 = arith.constant 1.000000e+00 : f32
    %118 = vector.broadcast %cst_77 : f32 to vector<1x8xf32>
    %119 = arith.divf %118, %117 : vector<1x8xf32>
    %cst_78 = arith.constant dense<0.000000e+00> : vector<1x8xf32>
    %120 = tpu.matmul %119, %4, %cst_78 {dimension_numbers = #tpu.dot_dimension_numbers<[1], [0], [0], [1], [0, 0, 1, 1], [], []>} : vector<1x8xf32>, vector<8x8xf32>, vector<1x8xf32> -> vector<1x8xf32>
    %cst_79 = arith.constant 1.000000e+00 : f32
    %121 = vector.broadcast %cst_79 : f32 to vector<1x8xf32>
    %122 = arith.divf %121, %120 : vector<1x8xf32>
    %cst_80 = arith.constant dense<0.000000e+00> : vector<1x8xf32>
    %123 = tpu.matmul %122, %3, %cst_80 {dimension_numbers = #tpu.dot_dimension_numbers<[1], [0], [0], [1], [0, 0, 1, 1], [], []>} : vector<1x8xf32>, vector<8x8xf32>, vector<1x8xf32> -> vector<1x8xf32>
    %cst_81 = arith.constant 1.000000e+00 : f32
    %124 = vector.broadcast %cst_81 : f32 to vector<1x8xf32>
    %125 = arith.divf %124, %123 : vector<1x8xf32>
    %126 = arith.mulf %3, %0 : vector<8x8xf32>
    %cst_82 = arith.constant dense<0.000000e+00> : vector<1x8xf32>
    %127 = tpu.matmul %122, %126, %cst_82 {dimension_numbers = #tpu.dot_dimension_numbers<[1], [0], [0], [1], [0, 0, 1, 1], [], []>} : vector<1x8xf32>, vector<8x8xf32>, vector<1x8xf32> -> vector<1x8xf32>
    %128 = arith.mulf %127, %125 : vector<1x8xf32>
    %129 = vector.shape_cast %128 : vector<1x8xf32> to vector<1x1x8xf32>
    %cst_83 = arith.constant dense<0.000000e+00> : vector<1xf32>
    %130 = vector.multi_reduction <add>, %129, %cst_83 [1, 2] : vector<1x1x8xf32> to vector<1xf32>
    %131 = vector.shape_cast %130 : vector<1xf32> to vector<1x1x1xf32>
    %132 = vector.extract %131[0, 0, 0] : f32 from vector<1x1x1xf32>
    %133 = vector.broadcast %132 : f32 to vector<1x1xf32>
    %cst_84 = arith.constant 1.000000e-03 : f32
    %134 = vector.broadcast %cst_84 : f32 to vector<1x1xf32>
    %135 = arith.mulf %134, %133 : vector<1x1xf32>
    %c0_85 = arith.constant 0 : index
    %c0_86 = arith.constant 0 : index
    %136 = vector.load %arg1[%c0_85, %c0_86] : memref<1x1xf32, #tpu.memory_space<vmem>>, vector<1x1xf32>
    tpu.vector_store %arg1[%c0_85, %c0_86], %135 {strides = array<i32>} : memref<1x1xf32, #tpu.memory_space<vmem>>, vector<1x1xf32>,
    return
  }
}

</mosaic_0001>

<bundles_post_ra>
// kernel: sinkhorn_loss.2
= control target key start
LH: loop header
LB: loop body
LE: loop exit
PB: predicated region body
PF: predicated region fallthrough
CT: control target
= control target key end

     0   :  { %7 = vsyncpa [#allocation3], 0  ;;  %s391_s0 = inlined_call_operand.hbm [shape: f32[8,32], index: 0, kind: input, shape index: {}]   ;;  %s392_s1 = inlined_call_operand.hbm [shape: f32[8,32], index: 1, kind: input, shape index: {}]   ;;  %s393_s2 = inlined_call_operand.vmem [shape: f32[8,8], index: 2, kind: output, shape index: {}]  }
   0x1   :  { %8 = vsyncpa [#allocation5], 0  ;;  %s324_s9 = smov [#allocation2]   ;;  %s325_s11 = smov [#allocation4]  }
   0x2   :  { %s15_s10 = sshll.u32 %s324_s9, 4  ;;  %s25_s12 = sshll.u32 %s325_s11, 4  ;;  %s16_s10 = int_to_ptr.vmem [resolvable:$true] %s15_s10  ;;  %s26_s12 = int_to_ptr.vmem [resolvable:$true] %s25_s12 }
   0x3   :  { %s276_s15 = scalar_lea.hbm %s391_s0, 128 }
   0x4   :  { %p277_p0 = scmp.ne.s32.totalorder %s391_s0, %s276_s15  ;;  %p280_p1 = scmp.lt.u32.totalorder %s276_s15, %s391_s0 }
   0x6   :  { %p282_p2 = pnand %p280_p1, %p277_p0 }
   0x8   :  { %285 = shalt.err (!%p282_p2)
}
   0x9   :  { %s286_s20 = scalar_lea.vmem %s16_s10, 128  ;;  %p291_p4 = scmp.lt.s32.totalorder %s16_s10, %s16_s10 }
   0xa   :  { %p287_p3 = scmp.ne.s32.totalorder %s16_s10, %s286_s20  ;;  %p292_p5 = scmp.lt.s32.totalorder %s286_s20, %s286_s20 }
   0xc   :  { %p293_p6 = por %p292_p5, %p291_p4 }
   0xe   :  { %p294_p7 = pnand %p293_p6, %p287_p3 }
  0x10   :  { %297 = shalt.err (!%p294_p7)
}
  0x11   :  { %18 = dma.hbm_to_vmem [thread:$0]  %s391_s0, 128, %s16_s10, [#allocation3]  }
  0x12   :  { %s298_s25 = scalar_lea.hbm %s392_s1, 128 }
  0x13   :  { %p299_p8 = scmp.ne.s32.totalorder %s392_s1, %s298_s25  ;;  %p302_p9 = scmp.lt.u32.totalorder %s298_s25, %s392_s1 }
  0x15   :  { %p304_p10 = pnand %p302_p9, %p299_p8 }
  0x17   :  { %307 = shalt.err (!%p304_p10)
}
  0x18   :  { %s308_s30 = scalar_lea.vmem %s26_s12, 128  ;;  %p313_p12 = scmp.lt.s32.totalorder %s26_s12, %s26_s12 }
  0x19   :  { %p309_p11 = scmp.ne.s32.totalorder %s26_s12, %s308_s30  ;;  %p314_p13 = scmp.lt.s32.totalorder %s308_s30, %s308_s30 }
  0x1b   :  { %p315_p0 = por %p314_p13, %p313_p12 }
  0x1d   :  { %p316_p1 = pnand %p315_p0, %p309_p11 }
  0x1f   :  { %319 = shalt.err (!%p316_p1)
}
  0x20   :  { %28 = dma.hbm_to_vmem [thread:$0]  %s392_s1, 128, %s26_s12, [#allocation5]  }
  0x21   :  { %320 = dma.done.wait [#allocation3], 128  }
  0x22   :  { %321 = vsyncadd [#allocation3], 4294967168 }
  0x23   :  { %322 = dma.done.wait [#allocation5], 128  }
  0x24   :  { %323 = vsyncadd [#allocation5], 4294967168  ;;  %v35_v0 = vld [vmem:[#allocation2] sm:$0xff]  ;;  %vm37_vm0 = vcmask 261120   ;;  %v49_v1 = vld [vmem:[#allocation4] sm:$0xff]  ;;  %v67_v16 = vlaneseq  ;;  %vm242_vm1 = vcmask 1041409  }
  0x25   :  { %v36_v2 = vmul.f32 0.5, %v35_v0  ;;  %v50_v3 = vmul.f32 0.5, %v49_v1  ;;  %v326_v21 = vmov 1966171168   ;;  %vm244_vm2 = vcmask 1042434  }
  0x26   :  { %v209_v17 = vand.u32 127, %v67_v16  ;;  %v68_v18 = vshrl.u32 %v67_v16, 7  ;;  %v65_v22 = vunpack.c.l.s4 %v326_v21  ;;  %vm246_vm3 = vcmask 1043459  }
  0x27   :  { %v38_v4 = vsel %vm37_vm0, %v36_v2, -inf  ;;  %v51_v5 = vsel %vm37_vm0, %v50_v3, -inf  ;;  %vm248_vm4 = vcmask 1044484   ;;  %vm250_vm5 = vcmask 1045509  }
  0x28   :  { %39 = vmax.xlane.f32.xlu0 %v38_v4  ;;  %v370_v19 = vsub.s32 %v209_v17, %v68_v18  ;;  %v66_v24 = vunpack.c.0.s8 %v65_v22  ;;  %v114_v29 = vsub.s32 0, %v68_v18  ;;  %vm252_vm6 = vcmask 1046534  }
  0x29   :  { %vm254_vm7 = vcmask 1047559   ;;  %vm257_vm8 = vcmask 64512  }
  0x2a   :  { %v69_v25 = vsub.s32 %v66_v24, %v68_v18 }
  0x2c   :  { %52 = vmax.xlane.f32.xlu0 %v51_v5 }
  0xb5   :  { %v40_v6 = vpop.xlane.xlu0 %39 }
  0xb6   :  { %v41_v7 = vsub.f32 %v36_v2, %v40_v6 }
  0xb8   :  { %v42_v8 = vmul.f32 1.442695, %v41_v7 }
  0xb9   :  { %v53_v9 = vpop.xlane.xlu0 %52 }
  0xba   :  { %268 = vpow2.f32 %v42_v8  ;;  %v54_v10 = vsub.f32 %v50_v3, %v53_v9 }
  0xbc   :  { %v55_v11 = vmul.f32 1.442695, %v54_v10 }
  0xbe   :  { %270 = vpow2.f32 %v55_v11 }
  0xc4   :  { %v269_v12 = vpop.eup %268 }
  0xc5   :  { %v44_v13 = vsel %vm37_vm0, %v269_v12, 0.0 }
  0xc6   :  { %45 = vadd.xlane.f32.xlu1 %v44_v13 }
  0xc8   :  { %v271_v14 = vpop.eup %270 }
  0xc9   :  { %v57_v15 = vsel %vm37_vm0, %v271_v14, 0.0 }
  0xca   :  { %58 = vadd.xlane.f32.xlu1 %v57_v15 }
 0x153   :  { %v46_v20 = vpop.xlane.xlu1 %45 }
 0x154   :  { %272 = vrcp.f32 %v46_v20 }
 0x157   :  { %v59_v23 = vpop.xlane.xlu1 %58 }
 0x158   :  { %274 = vrcp.f32 %v59_v23 }
 0x15e   :  { %v273_v26 = vpop.eup %272 }
 0x15f   :  { %v48_v27 = vmul.f32 %v273_v26, %v269_v12 }
 0x161   :  { %v70_v28 = vrot.slane %v48_v27, %v69_v25  ;;  %v63_v30 = vcombine.high %v48_v27, %v48_v27 }
 0x162   :  { %v275_v31 = vpop.eup %274 }
 0x163   :  { %v86_v32 = vrot.slane %v70_v28, %v69_v25  ;;  %v78_v33 = vcombine.high %v70_v28, %v70_v28  ;;  %v77_v34 = vrot.slane %v63_v30, %v69_v25  ;;  %v61_v35 = vmul.f32 %v275_v31, %v271_v14 }
 0x165   :  { %v115_v36 = vrot.slane %v86_v32, %v114_v29  ;;  %v100_v37 = vrot.slane %v78_v33, %v69_v25  ;;  %v108_v38 = vcombine.high %v86_v32, %v86_v32  ;;  %v93_v39 = vrot.slane %v77_v34, %v69_v25 }
 0x166   :  { %v79_v40 = vcombine.high %v77_v34, %v77_v34 }
 0x167   :  { %v152_v41 = vsub.f32 %v115_v36, %v61_v35  ;;  %v119_v42 = vrot.slane %v100_v37, %v114_v29  ;;  %v123_v43 = vrot.slane %v108_v38, %v114_v29  ;;  %v110_v44 = vcombine.high %v100_v37, %v100_v37 }
 0x168   :  { %v131_v45 = vrot.slane %v93_v39, %v114_v29  ;;  %v107_v46 = vrot.slane %v79_v40, %v69_v25  ;;  %v109_v47 = vcombine.high %v93_v39, %v93_v39 }
 0x169   :  { %v160_v48 = vand.u32 2147483647, %v152_v41  ;;  %v153_v49 = vsub.f32 %v119_v42, %v61_v35  ;;  %v154_v50 = vsub.f32 %v123_v43, %v61_v35  ;;  %v127_v51 = vrot.slane %v110_v44, %v114_v29 }
 0x16a   :  { %v156_v52 = vsub.f32 %v131_v45, %v61_v35  ;;  %v135_v53 = vrot.slane %v107_v46, %v114_v29  ;;  %v139_v54 = vrot.slane %v109_v47, %v114_v29  ;;  %v111_v55 = vcombine.high %v107_v46, %v107_v46 }
 0x16b   :  { %v168_v56 = vsel %vm37_vm0, %v160_v48, 0.0  ;;  %v161_v57 = vand.u32 2147483647, %v153_v49  ;;  %v162_v58 = vand.u32 2147483647, %v154_v50  ;;  %v155_v59 = vsub.f32 %v127_v51, %v61_v35 }
 0x16c   :  { %169 = vadd.xlane.f32.xlu0 %v168_v56  ;;  %v157_v62 = vsub.f32 %v135_v53, %v61_v35  ;;  %v143_v63 = vrot.slane %v111_v55, %v114_v29  ;;  %v164_v1 = vand.u32 2147483647, %v156_v52  ;;  %v158_v2 = vsub.f32 %v139_v54, %v61_v35 }
 0x16d   :  { %v171_v60 = vsel %vm37_vm0, %v161_v57, 0.0  ;;  %v163_v61 = vand.u32 2147483647, %v155_v59  ;;  %v174_v0 = vsel %vm37_vm0, %v162_v58, 0.0 }
 0x16e   :  { %172 = vadd.xlane.f32.xlu1 %v171_v60  ;;  %v165_v4 = vand.u32 2147483647, %v157_v62  ;;  %v159_v5 = vsub.f32 %v143_v63, %v61_v35  ;;  %v180_v6 = vsel %vm37_vm0, %v164_v1, 0.0  ;;  %v166_v7 = vand.u32 2147483647, %v158_v2 }
 0x16f   :  { %v177_v3 = vsel %vm37_vm0, %v163_v61, 0.0 }
 0x170   :  { %175 = vadd.xlane.f32.xlu0 %v174_v0  ;;  %v183_v8 = vsel %vm37_vm0, %v165_v4, 0.0  ;;  %v167_v9 = vand.u32 2147483647, %v159_v5  ;;  %v186_v10 = vsel %vm37_vm0, %v166_v7, 0.0 }
 0x172   :  { %178 = vadd.xlane.f32.xlu1 %v177_v3  ;;  %v189_v11 = vsel %vm37_vm0, %v167_v9, 0.0 }
 0x174   :  { %181 = vadd.xlane.f32.xlu0 %v180_v6 }
 0x176   :  { %184 = vadd.xlane.f32.xlu1 %v183_v8 }
 0x178   :  { %187 = vadd.xlane.f32.xlu0 %v186_v10 }
 0x17a   :  { %190 = vadd.xlane.f32.xlu1 %v189_v11 }
 0x1f9   :  { %v170_v12 = vpop.xlane.xlu0 %169 }
 0x1fa   :  { %v213_v14 = vrot.slane %v170_v12, %v370_v19 }
 0x1fb   :  { %v173_v13 = vpop.xlane.xlu1 %172 }
 0x1fc   :  { %v217_v15 = vrot.slane %v173_v13, %v370_v19 }
 0x1fd   :  { %v176_v16 = vpop.xlane.xlu0 %175 }
 0x1fe   :  { %v243_v17 = vsel %vm242_vm1, %v217_v15, %v213_v14  ;;  %v221_v18 = vrot.slane %v176_v16, %v370_v19 }
 0x1ff   :  { %v179_v20 = vpop.xlane.xlu1 %178 }
 0x200   :  { %v245_v21 = vsel %vm244_vm2, %v221_v18, %v243_v17  ;;  %v225_v22 = vrot.slane %v179_v20, %v370_v19 }
 0x201   :  { %v182_v23 = vpop.xlane.xlu0 %181 }
 0x202   :  { %v247_v24 = vsel %vm246_vm3, %v225_v22, %v245_v21  ;;  %v229_v25 = vrot.slane %v182_v23, %v370_v19 }
 0x203   :  { %v185_v26 = vpop.xlane.xlu1 %184 }
 0x204   :  { %v249_v27 = vsel %vm248_vm4, %v229_v25, %v247_v24  ;;  %v233_v28 = vrot.slane %v185_v26, %v370_v19 }
 0x205   :  { %v188_v29 = vpop.xlane.xlu0 %187 }
 0x206   :  { %v251_v30 = vsel %vm250_vm5, %v233_v28, %v249_v27  ;;  %v237_v31 = vrot.slane %v188_v29, %v370_v19 }
 0x207   :  { %v191_v32 = vpop.xlane.xlu1 %190 }
 0x208   :  { %v253_v33 = vsel %vm252_vm6, %v237_v31, %v251_v30  ;;  %v241_v34 = vrot.slane %v191_v32, %v370_v19 }
 0x20a   :  { %v255_v35 = vsel %vm254_vm7, %v241_v34, %v253_v33 }
 0x20b   :  { %258 = vst.msk [vmem:[%s393_s2] sm:$0xff] %vm257_vm8, %v255_v35 }
 0x20c   :  { %263 = vsyncpa [#allocation3], 1 }
 0x20d   :  { %264 = vsyncpa [#allocation5], 1 }

// kernel: sinkhorn_loss.3
= control target key start
LH: loop header
LB: loop body
LE: loop exit
PB: predicated region body
PF: predicated region fallthrough
CT: control target
= control target key end

     0   :  { %v3578_v1 = vmov 0.0   ;;  %vm3579_vm0 = vmmov 0   ;;  %s3838_s0 = inlined_call_operand.vmem [shape: f32[8,8], index: 0, kind: input, shape index: {}]   ;;  %s3839_s1 = inlined_call_operand.hbm [shape: f32[1,1], index: 1, kind: output, shape index: {}]  }
   0x1   :  { %v3595_v0 = vld [vmem:[%s3838_s0] sm:$0xff]  ;;  %3261 = vmatprep.subr.mxu0 %v3578_v1  ;;  %3263 = vmatprep.mubr.msk.f32.mxu0 %vm3579_vm0, %v3578_v1 }
   0x2   :  { %v10_v2 = vmul.f32 -10.0, %v3595_v0 }
   0x3   :  { %6 = vsyncpa [#allocation3], 0  ;;  %3266 = vmatprep.subr.mxu1 %v3578_v1  ;;  %3268 = vmatprep.mubr.msk.f32.mxu1 %vm3579_vm0, %v3578_v1  ;;  %vm13_vm1 = vcmask 64512   ;;  %v3580_v5 = vmov 1.0   ;;  %vm3089_vm2 = vcmask 57344   ;;  %s3581_s0 = smov [#allocation2]  }
   0x4   :  { %v11_v3 = vmul.f32 1.442695, %v10_v2  ;;  %s3110_s8 = sshll.u32 %s3581_s0, 4  ;;  %vm3102_vm3 = vcmask 0   ;;  %s3111_s8 = int_to_ptr.vmem [resolvable:$true] %s3110_s8 }
   0x5   :  { %s3554_s10 = scalar_lea.vmem %s3111_s8, 16  ;;  %s3558_s11 = scalar_lea.vmem %s3111_s8, 32 }
   0x6   :  { %3472 = vpow2.f32 %v11_v3  ;;  %p3555_p0 = scmp.ne.s32.totalorder %s3111_s8, %s3554_s10  ;;  %p3559_p1 = scmp.lt.s32.totalorder %s3111_s8, %s3111_s8 }
   0x7   :  { %p3560_p2 = scmp.lt.s32.totalorder %s3558_s11, %s3554_s10 }
   0x9   :  { %p3561_p3 = por %p3560_p2, %p3559_p1 }
   0xb   :  { %p3562_p4 = pnand %p3561_p3, %p3555_p0 }
  0x10   :  { %v3604_v4 = vpop.eup %3472 }
  0x11   :  { %3262 = vmatpush3.xpose.msk.msra.mxu0 %vm13_vm1, %v3604_v4  ;;  %3267 = vmatpush3.msra.mxu1 %v3604_v4 }
  0x12   :  { %3271 = vmatprep.subr.mxu1 %v3578_v1  ;;  %3276 = vmatprep.subr.mxu0 %v3578_v1 }
  0x14   :  { %3264 = vmatmul.mubr.msk.f32.vlgmr.msra.gmra.mrb[0].mxu0 %vm13_vm1, %v3580_v5 }
  0x15   :  { %3277 = vmatpush3.msra.mxu0 %v3604_v4  ;;  %3278 = vmatprep.mubr.msk.f32.mxu0 %vm3579_vm0, %v3578_v1 }
  0x16   :  { %3286 = vmatprep.subr.mxu0 %v3578_v1 }
  0xe7   :  { %v86_v6 = vpop.f32.mrb[0].mxu0 }
  0xe8   :  { %3474 = vrcp.f32 %v86_v6  ;;  %v3265_v7 = vpop.f32.mrb[1].mxu0 }
  0xf2   :  { %v3475_v8 = vpop.eup %3474 }
  0xf3   :  { %3269 = vmatmul.mubr.msk.f32.vlgmr.msra.gmra.mrb[0].mxu1 %vm13_vm1, %v3475_v8 }
  0xf4   :  { %3272 = vmatpush3.xpose.msk.msra.mxu1 %vm13_vm1, %v3604_v4  ;;  %3273 = vmatprep.mubr.msk.f32.mxu1 %vm3579_vm0, %v3578_v1 }
  0xf5   :  { %3281 = vmatprep.subr.mxu1 %v3578_v1 }
 0x1c6   :  { %v161_v9 = vpop.f32.mrb[0].mxu1 }
 0x1c7   :  { %3476 = vrcp.f32 %v161_v9  ;;  %v3270_v10 = vpop.f32.mrb[1].mxu1 }
 0x1d1   :  { %v3477_v11 = vpop.eup %3476 }
 0x1d2   :  { %3274 = vmatmul.mubr.msk.f32.vlgmr.msra.gmra.mrb[2].mxu1 %vm13_vm1, %v3477_v11 }
 0x1d3   :  { %3282 = vmatpush3.xpose.msk.msra.mxu1 %vm13_vm1, %v3604_v4  ;;  %3283 = vmatprep.mubr.msk.f32.mxu1 %vm3579_vm0, %v3578_v1 }
 0x1d4   :  { %3291 = vmatprep.subr.mxu1 %v3578_v1 }
 0x2a5   :  { %v236_v12 = vpop.f32.mrb[2].mxu1 }
 0x2a6   :  { %3478 = vrcp.f32 %v236_v12  ;;  %v3275_v13 = vpop.f32.mrb[3].mxu1 }
 0x2b0   :  { %v3479_v14 = vpop.eup %3478 }
 0x2b1   :  { %3279 = vmatmul.mubr.msk.f32.vlgmr.msra.gmra.mrb[2].mxu0 %vm13_vm1, %v3479_v14 }
 0x2b2   :  { %3287 = vmatpush3.msra.mxu0 %v3604_v4  ;;  %3288 = vmatprep.mubr.msk.f32.mxu0 %vm3579_vm0, %v3578_v1 }
 0x2b3   :  { %3296 = vmatprep.subr.mxu0 %v3578_v1 }
 0x384   :  { %v311_v15 = vpop.f32.mrb[2].mxu0 }
 0x385   :  { %3480 = vrcp.f32 %v311_v15  ;;  %v3280_v16 = vpop.f32.mrb[3].mxu0 }
 0x38f   :  { %v3481_v17 = vpop.eup %3480 }
 0x390   :  { %3284 = vmatmul.mubr.msk.f32.vlgmr.msra.gmra.mrb[4].mxu1 %vm13_vm1, %v3481_v17 }
 0x391   :  { %3292 = vmatpush3.xpose.msk.msra.mxu1 %vm13_vm1, %v3604_v4  ;;  %3293 = vmatprep.mubr.msk.f32.mxu1 %vm3579_vm0, %v3578_v1 }
 0x392   :  { %3301 = vmatprep.subr.mxu1 %v3578_v1 }
 0x463   :  { %v386_v18 = vpop.f32.mrb[4].mxu1 }
 0x464   :  { %3482 = vrcp.f32 %v386_v18  ;;  %v3285_v19 = vpop.f32.mrb[5].mxu1 }
 0x46e   :  { %v3483_v20 = vpop.eup %3482 }
 0x46f   :  { %3289 = vmatmul.mubr.msk.f32.vlgmr.msra.gmra.mrb[4].mxu0 %vm13_vm1, %v3483_v20 }
 0x470   :  { %3297 = vmatpush3.msra.mxu0 %v3604_v4  ;;  %3298 = vmatprep.mubr.msk.f32.mxu0 %vm3579_vm0, %v3578_v1 }
 0x471   :  { %3306 = vmatprep.subr.mxu0 %v3578_v1 }
 0x542   :  { %v461_v21 = vpop.f32.mrb[4].mxu0 }
 0x543   :  { %3484 = vrcp.f32 %v461_v21  ;;  %v3290_v22 = vpop.f32.mrb[5].mxu0 }
 0x54d   :  { %v3485_v23 = vpop.eup %3484 }
 0x54e   :  { %3294 = vmatmul.mubr.msk.f32.vlgmr.msra.gmra.mrb[6].mxu1 %vm13_vm1, %v3485_v23 }
 0x54f   :  { %3302 = vmatpush3.xpose.msk.msra.mxu1 %vm13_vm1, %v3604_v4  ;;  %3303 = vmatprep.mubr.msk.f32.mxu1 %vm3579_vm0, %v3578_v1 }
 0x550   :  { %3311 = vmatprep.subr.mxu1 %v3578_v1 }
 0x621   :  { %v536_v24 = vpop.f32.mrb[6].mxu1 }
 0x622   :  { %3486 = vrcp.f32 %v536_v24  ;;  %v3295_v25 = vpop.f32.mrb[7].mxu1 }
 0x62c   :  { %v3487_v26 = vpop.eup %3486 }
 0x62d   :  { %3299 = vmatmul.mubr.msk.f32.vlgmr.msra.gmra.mrb[6].mxu0 %vm13_vm1, %v3487_v26 }
 0x62e   :  { %3307 = vmatpush3.msra.mxu0 %v3604_v4  ;;  %3308 = vmatprep.mubr.msk.f32.mxu0 %vm3579_vm0, %v3578_v1 }
 0x62f   :  { %3316 = vmatprep.subr.mxu0 %v3578_v1 }
 0x700   :  { %v611_v27 = vpop.f32.mrb[6].mxu0 }
 0x701   :  { %3488 = vrcp.f32 %v611_v27  ;;  %v3300_v28 = vpop.f32.mrb[7].mxu0 }
 0x70b   :  { %v3489_v29 = vpop.eup %3488 }
 0x70c   :  { %3304 = vmatmul.mubr.msk.f32.vlgmr.msra.gmra.mrb[8].mxu1 %vm13_vm1, %v3489_v29 }
 0x70d   :  { %3312 = vmatpush3.xpose.msk.msra.mxu1 %vm13_vm1, %v3604_v4  ;;  %3313 = vmatprep.mubr.msk.f32.mxu1 %vm3579_vm0, %v3578_v1 }
 0x70e   :  { %3321 = vmatprep.subr.mxu1 %v3578_v1 }
 0x7df   :  { %v686_v30 = vpop.f32.mrb[8].mxu1 }
 0x7e0   :  { %3490 = vrcp.f32 %v686_v30  ;;  %v3305_v31 = vpop.f32.mrb[9].mxu1 }
 0x7ea   :  { %v3491_v32 = vpop.eup %3490 }
 0x7eb   :  { %3309 = vmatmul.mubr.msk.f32.vlgmr.msra.gmra.mrb[8].mxu0 %vm13_vm1, %v3491_v32 }
 0x7ec   :  { %3317 = vmatpush3.msra.mxu0 %v3604_v4  ;;  %3318 = vmatprep.mubr.msk.f32.mxu0 %vm3579_vm0, %v3578_v1 }
 0x7ed   :  { %3326 = vmatprep.subr.mxu0 %v3578_v1 }
 0x8be   :  { %v761_v33 = vpop.f32.mrb[8].mxu0 }
 0x8bf   :  { %3492 = vrcp.f32 %v761_v33  ;;  %v3310_v34 = vpop.f32.mrb[9].mxu0 }
 0x8c9   :  { %v3493_v35 = vpop.eup %3492 }
 0x8ca   :  { %3314 = vmatmul.mubr.msk.f32.vlgmr.msra.gmra.mrb[10].mxu1 %vm13_vm1, %v3493_v35 }
 0x8cb   :  { %3322 = vmatpush3.xpose.msk.msra.mxu1 %vm13_vm1, %v3604_v4  ;;  %3323 = vmatprep.mubr.msk.f32.mxu1 %vm3579_vm0, %v3578_v1 }
 0x8cc   :  { %3331 = vmatprep.subr.mxu1 %v3578_v1 }
 0x99d   :  { %v836_v36 = vpop.f32.mrb[10].mxu1 }
 0x99e   :  { %3494 = vrcp.f32 %v836_v36  ;;  %v3315_v37 = vpop.f32.mrb[11].mxu1 }
 0x9a8   :  { %v3495_v38 = vpop.eup %3494 }
 0x9a9   :  { %3319 = vmatmul.mubr.msk.f32.vlgmr.msra.gmra.mrb[10].mxu0 %vm13_vm1, %v3495_v38 }
 0x9aa   :  { %3327 = vmatpush3.msra.mxu0 %v3604_v4  ;;  %3328 = vmatprep.mubr.msk.f32.mxu0 %vm3579_vm0, %v3578_v1 }
 0x9ab   :  { %3336 = vmatprep.subr.mxu0 %v3578_v1 }
 0xa7c   :  { %v911_v39 = vpop.f32.mrb[10].mxu0 }
 0xa7d   :  { %3496 = vrcp.f32 %v911_v39  ;;  %v3320_v40 = vpop.f32.mrb[11].mxu0 }
 0xa87   :  { %v3497_v41 = vpop.eup %3496 }
 0xa88   :  { %3324 = vmatmul.mubr.msk.f32.vlgmr.msra.gmra.mrb[12].mxu1 %vm13_vm1, %v3497_v41 }
 0xa89   :  { %3332 = vmatpush3.xpose.msk.msra.mxu1 %vm13_vm1, %v3604_v4  ;;  %3333 = vmatprep.mubr.msk.f32.mxu1 %vm3579_vm0, %v3578_v1 }
 0xa8a   :  { %3341 = vmatprep.subr.mxu1 %v3578_v1 }
 0xb5b   :  { %v986_v42 = vpop.f32.mrb[12].mxu1 }
 0xb5c   :  { %3498 = vrcp.f32 %v986_v42  ;;  %v3325_v43 = vpop.f32.mrb[13].mxu1 }
 0xb66   :  { %v3499_v44 = vpop.eup %3498 }
 0xb67   :  { %3329 = vmatmul.mubr.msk.f32.vlgmr.msra.gmra.mrb[12].mxu0 %vm13_vm1, %v3499_v44 }
 0xb68   :  { %3337 = vmatpush3.msra.mxu0 %v3604_v4  ;;  %3338 = vmatprep.mubr.msk.f32.mxu0 %vm3579_vm0, %v3578_v1 }
 0xb69   :  { %3346 = vmatprep.subr.mxu0 %v3578_v1 }
 0xc3a   :  { %v1061_v45 = vpop.f32.mrb[12].mxu0 }
 0xc3b   :  { %3500 = vrcp.f32 %v1061_v45  ;;  %v3330_v46 = vpop.f32.mrb[13].mxu0 }
 0xc45   :  { %v3501_v47 = vpop.eup %3500 }
 0xc46   :  { %3334 = vmatmul.mubr.msk.f32.vlgmr.msra.gmra.mrb[14].mxu1 %vm13_vm1, %v3501_v47 }
 0xc47   :  { %3342 = vmatpush3.xpose.msk.msra.mxu1 %vm13_vm1, %v3604_v4  ;;  %3343 = vmatprep.mubr.msk.f32.mxu1 %vm3579_vm0, %v3578_v1 }
 0xc48   :  { %3351 = vmatprep.subr.mxu1 %v3578_v1 }
 0xd19   :  { %v1136_v48 = vpop.f32.mrb[14].mxu1 }
 0xd1a   :  { %3502 = vrcp.f32 %v1136_v48  ;;  %v3335_v49 = vpop.f32.mrb[15].mxu1 }
 0xd24   :  { %v3503_v50 = vpop.eup %3502 }
 0xd25   :  { %3339 = vmatmul.mubr.msk.f32.vlgmr.msra.gmra.mrb[14].mxu0 %vm13_vm1, %v3503_v50 }
 0xd26   :  { %3347 = vmatpush3.msra.mxu0 %v3604_v4  ;;  %3348 = vmatprep.mubr.msk.f32.mxu0 %vm3579_vm0, %v3578_v1 }
 0xd27   :  { %3356 = vmatprep.subr.mxu0 %v3578_v1 }
 0xdf8   :  { %v1211_v51 = vpop.f32.mrb[14].mxu0 }
 0xdf9   :  { %3504 = vrcp.f32 %v1211_v51  ;;  %v3340_v52 = vpop.f32.mrb[15].mxu0 }
 0xe03   :  { %v3505_v53 = vpop.eup %3504 }
 0xe04   :  { %3344 = vmatmul.mubr.msk.f32.vlgmr.msra.gmra.mrb[16].mxu1 %vm13_vm1, %v3505_v53 }
 0xe05   :  { %3352 = vmatpush3.xpose.msk.msra.mxu1 %vm13_vm1, %v3604_v4  ;;  %3353 = vmatprep.mubr.msk.f32.mxu1 %vm3579_vm0, %v3578_v1 }
 0xe06   :  { %3361 = vmatprep.subr.mxu1 %v3578_v1 }
 0xed7   :  { %v1286_v54 = vpop.f32.mrb[16].mxu1 }
 0xed8   :  { %3506 = vrcp.f32 %v1286_v54  ;;  %v3345_v55 = vpop.f32.mrb[17].mxu1 }
 0xee2   :  { %v3507_v56 = vpop.eup %3506 }
 0xee3   :  { %3349 = vmatmul.mubr.msk.f32.vlgmr.msra.gmra.mrb[16].mxu0 %vm13_vm1, %v3507_v56 }
 0xee4   :  { %3357 = vmatpush3.msra.mxu0 %v3604_v4  ;;  %3358 = vmatprep.mubr.msk.f32.mxu0 %vm3579_vm0, %v3578_v1 }
 0xee5   :  { %3366 = vmatprep.subr.mxu0 %v3578_v1 }
 0xfb6   :  { %v1361_v57 = vpop.f32.mrb[16].mxu0 }
 0xfb7   :  { %3508 = vrcp.f32 %v1361_v57  ;;  %v3350_v58 = vpop.f32.mrb[17].mxu0 }
 0xfc1   :  { %v3509_v59 = vpop.eup %3508 }
 0xfc2   :  { %3354 = vmatmul.mubr.msk.f32.vlgmr.msra.gmra.mrb[18].mxu1 %vm13_vm1, %v3509_v59  ;;  %v3017_v59 = vmul.f32 %v3604_v4, %v3595_v0 }
 0xfc3   :  { %3362 = vmatpush3.xpose.msk.msra.mxu1 %vm13_vm1, %v3604_v4  ;;  %3363 = vmatprep.mubr.msk.f32.mxu1 %vm3579_vm0, %v3578_v1 }
 0xfc4   :  { %3371 = vmatprep.subr.mxu1 %v3578_v1 }
0x1095   :  { %v1436_v60 = vpop.f32.mrb[18].mxu1 }
0x1096   :  { %3510 = vrcp.f32 %v1436_v60  ;;  %v3355_v61 = vpop.f32.mrb[19].mxu1 }
0x10a0   :  { %v3511_v62 = vpop.eup %3510 }
0x10a1   :  { %3359 = vmatmul.mubr.msk.f32.vlgmr.msra.gmra.mrb[18].mxu0 %vm13_vm1, %v3511_v62 }
0x10a2   :  { %3367 = vmatpush3.msra.mxu0 %v3604_v4  ;;  %3368 = vmatprep.mubr.msk.f32.mxu0 %vm3579_vm0, %v3578_v1 }
0x10a3   :  { %3376 = vmatprep.subr.mxu0 %v3578_v1 }
0x1174   :  { %v1511_v63 = vpop.f32.mrb[18].mxu0 }
0x1175   :  { %3512 = vrcp.f32 %v1511_v63  ;;  %v3360_v2 = vpop.f32.mrb[19].mxu0 }
0x117f   :  { %v3513_v3 = vpop.eup %3512 }
0x1180   :  { %3364 = vmatmul.mubr.msk.f32.vlgmr.msra.gmra.mrb[20].mxu1 %vm13_vm1, %v3513_v3 }
0x1181   :  { %3372 = vmatpush3.xpose.msk.msra.mxu1 %vm13_vm1, %v3604_v4  ;;  %3373 = vmatprep.mubr.msk.f32.mxu1 %vm3579_vm0, %v3578_v1 }
0x1182   :  { %3381 = vmatprep.subr.mxu1 %v3578_v1 }
0x1253   :  { %v1586_v5 = vpop.f32.mrb[20].mxu1 }
0x1254   :  { %3514 = vrcp.f32 %v1586_v5  ;;  %v3365_v6 = vpop.f32.mrb[21].mxu1 }
0x125e   :  { %v3515_v7 = vpop.eup %3514 }
0x125f   :  { %3369 = vmatmul.mubr.msk.f32.vlgmr.msra.gmra.mrb[20].mxu0 %vm13_vm1, %v3515_v7 }
0x1260   :  { %3377 = vmatpush3.msra.mxu0 %v3604_v4  ;;  %3378 = vmatprep.mubr.msk.f32.mxu0 %vm3579_vm0, %v3578_v1 }
0x1261   :  { %3386 = vmatprep.subr.mxu0 %v3578_v1 }
0x1332   :  { %v1661_v8 = vpop.f32.mrb[20].mxu0 }
0x1333   :  { %3516 = vrcp.f32 %v1661_v8  ;;  %v3370_v9 = vpop.f32.mrb[21].mxu0 }
0x133d   :  { %v3517_v10 = vpop.eup %3516 }
0x133e   :  { %3374 = vmatmul.mubr.msk.f32.vlgmr.msra.gmra.mrb[22].mxu1 %vm13_vm1, %v3517_v10 }
0x133f   :  { %3382 = vmatpush3.xpose.msk.msra.mxu1 %vm13_vm1, %v3604_v4  ;;  %3383 = vmatprep.mubr.msk.f32.mxu1 %vm3579_vm0, %v3578_v1 }
0x1340   :  { %3391 = vmatprep.subr.mxu1 %v3578_v1 }
0x1411   :  { %v1736_v11 = vpop.f32.mrb[22].mxu1 }
0x1412   :  { %3518 = vrcp.f32 %v1736_v11  ;;  %v3375_v12 = vpop.f32.mrb[23].mxu1 }
0x141c   :  { %v3519_v13 = vpop.eup %3518 }
0x141d   :  { %3379 = vmatmul.mubr.msk.f32.vlgmr.msra.gmra.mrb[22].mxu0 %vm13_vm1, %v3519_v13 }
0x141e   :  { %3387 = vmatpush3.msra.mxu0 %v3604_v4  ;;  %3388 = vmatprep.mubr.msk.f32.mxu0 %vm3579_vm0, %v3578_v1 }
0x141f   :  { %3396 = vmatprep.subr.mxu0 %v3578_v1 }
0x14f0   :  { %v1811_v14 = vpop.f32.mrb[22].mxu0 }
0x14f1   :  { %3520 = vrcp.f32 %v1811_v14  ;;  %v3380_v15 = vpop.f32.mrb[23].mxu0 }
0x14fb   :  { %v3521_v16 = vpop.eup %3520 }
0x14fc   :  { %3384 = vmatmul.mubr.msk.f32.vlgmr.msra.gmra.mrb[24].mxu1 %vm13_vm1, %v3521_v16 }
0x14fd   :  { %3392 = vmatpush3.xpose.msk.msra.mxu1 %vm13_vm1, %v3604_v4  ;;  %3393 = vmatprep.mubr.msk.f32.mxu1 %vm3579_vm0, %v3578_v1 }
0x14fe   :  { %3401 = vmatprep.subr.mxu1 %v3578_v1 }
0x15cf   :  { %v1886_v17 = vpop.f32.mrb[24].mxu1 }
0x15d0   :  { %3522 = vrcp.f32 %v1886_v17  ;;  %v3385_v18 = vpop.f32.mrb[25].mxu1 }
0x15da   :  { %v3523_v19 = vpop.eup %3522 }
0x15db   :  { %3389 = vmatmul.mubr.msk.f32.vlgmr.msra.gmra.mrb[24].mxu0 %vm13_vm1, %v3523_v19 }
0x15dc   :  { %3397 = vmatpush3.msra.mxu0 %v3604_v4  ;;  %3398 = vmatprep.mubr.msk.f32.mxu0 %vm3579_vm0, %v3578_v1 }
0x15dd   :  { %3406 = vmatprep.subr.mxu0 %v3578_v1 }
0x16ae   :  { %v1961_v20 = vpop.f32.mrb[24].mxu0 }
0x16af   :  { %3524 = vrcp.f32 %v1961_v20  ;;  %v3390_v21 = vpop.f32.mrb[25].mxu0 }
0x16b9   :  { %v3525_v22 = vpop.eup %3524 }
0x16ba   :  { %3394 = vmatmul.mubr.msk.f32.vlgmr.msra.gmra.mrb[26].mxu1 %vm13_vm1, %v3525_v22 }
0x16bb   :  { %3402 = vmatpush3.xpose.msk.msra.mxu1 %vm13_vm1, %v3604_v4  ;;  %3403 = vmatprep.mubr.msk.f32.mxu1 %vm3579_vm0, %v3578_v1 }
0x16bc   :  { %3411 = vmatprep.subr.mxu1 %v3578_v1 }
0x178d   :  { %v2036_v23 = vpop.f32.mrb[26].mxu1 }
0x178e   :  { %3526 = vrcp.f32 %v2036_v23  ;;  %v3395_v24 = vpop.f32.mrb[27].mxu1 }
0x1798   :  { %v3527_v25 = vpop.eup %3526 }
0x1799   :  { %3399 = vmatmul.mubr.msk.f32.vlgmr.msra.gmra.mrb[26].mxu0 %vm13_vm1, %v3527_v25 }
0x179a   :  { %3407 = vmatpush3.msra.mxu0 %v3604_v4  ;;  %3408 = vmatprep.mubr.msk.f32.mxu0 %vm3579_vm0, %v3578_v1 }
0x179b   :  { %3416 = vmatprep.subr.mxu0 %v3578_v1 }
0x186c   :  { %v2111_v26 = vpop.f32.mrb[26].mxu0 }
0x186d   :  { %3528 = vrcp.f32 %v2111_v26  ;;  %v3400_v27 = vpop.f32.mrb[27].mxu0 }
0x1877   :  { %v3529_v28 = vpop.eup %3528 }
0x1878   :  { %3404 = vmatmul.mubr.msk.f32.vlgmr.msra.gmra.mrb[28].mxu1 %vm13_vm1, %v3529_v28 }
0x1879   :  { %3412 = vmatpush3.xpose.msk.msra.mxu1 %vm13_vm1, %v3604_v4  ;;  %3413 = vmatprep.mubr.msk.f32.mxu1 %vm3579_vm0, %v3578_v1 }
0x187a   :  { %3421 = vmatprep.subr.mxu1 %v3578_v1 }
0x194b   :  { %v2186_v29 = vpop.f32.mrb[28].mxu1 }
0x194c   :  { %3530 = vrcp.f32 %v2186_v29  ;;  %v3405_v30 = vpop.f32.mrb[29].mxu1 }
0x1956   :  { %v3531_v31 = vpop.eup %3530 }
0x1957   :  { %3409 = vmatmul.mubr.msk.f32.vlgmr.msra.gmra.mrb[28].mxu0 %vm13_vm1, %v3531_v31 }
0x1958   :  { %3417 = vmatpush3.msra.mxu0 %v3604_v4  ;;  %3418 = vmatprep.mubr.msk.f32.mxu0 %vm3579_vm0, %v3578_v1 }
0x1959   :  { %3426 = vmatprep.subr.mxu0 %v3578_v1 }
0x1a2a   :  { %v2261_v32 = vpop.f32.mrb[28].mxu0 }
0x1a2b   :  { %3532 = vrcp.f32 %v2261_v32  ;;  %v3410_v33 = vpop.f32.mrb[29].mxu0 }
0x1a35   :  { %v3533_v34 = vpop.eup %3532 }
0x1a36   :  { %3414 = vmatmul.mubr.msk.f32.vlgmr.msra.gmra.mrb[30].mxu1 %vm13_vm1, %v3533_v34 }
0x1a37   :  { %3422 = vmatpush3.xpose.msk.msra.mxu1 %vm13_vm1, %v3604_v4  ;;  %3423 = vmatprep.mubr.msk.f32.mxu1 %vm3579_vm0, %v3578_v1 }
0x1a38   :  { %3431 = vmatprep.subr.mxu1 %v3578_v1 }
0x1b09   :  { %v2336_v35 = vpop.f32.mrb[30].mxu1 }
0x1b0a   :  { %3534 = vrcp.f32 %v2336_v35  ;;  %v3415_v36 = vpop.f32.mrb[31].mxu1 }
0x1b14   :  { %v3535_v37 = vpop.eup %3534 }
0x1b15   :  { %3419 = vmatmul.mubr.msk.f32.vlgmr.msra.gmra.mrb[30].mxu0 %vm13_vm1, %v3535_v37 }
0x1b16   :  { %3427 = vmatpush3.msra.mxu0 %v3604_v4  ;;  %3428 = vmatprep.mubr.msk.f32.mxu0 %vm3579_vm0, %v3578_v1 }
0x1b17   :  { %3436 = vmatprep.subr.mxu0 %v3578_v1 }
0x1be8   :  { %v2411_v38 = vpop.f32.mrb[30].mxu0 }
0x1be9   :  { %3536 = vrcp.f32 %v2411_v38  ;;  %v3420_v39 = vpop.f32.mrb[31].mxu0 }
0x1bf3   :  { %v3537_v40 = vpop.eup %3536 }
0x1bf4   :  { %3424 = vmatmul.mubr.msk.f32.vlgmr.msra.gmra.mrb[32].mxu1 %vm13_vm1, %v3537_v40 }
0x1bf5   :  { %3432 = vmatpush3.xpose.msk.msra.mxu1 %vm13_vm1, %v3604_v4  ;;  %3433 = vmatprep.mubr.msk.f32.mxu1 %vm3579_vm0, %v3578_v1 }
0x1bf6   :  { %3441 = vmatprep.subr.mxu1 %v3578_v1 }
0x1cc7   :  { %v2486_v41 = vpop.f32.mrb[32].mxu1 }
0x1cc8   :  { %3538 = vrcp.f32 %v2486_v41  ;;  %v3425_v42 = vpop.f32.mrb[33].mxu1 }
0x1cd2   :  { %v3539_v43 = vpop.eup %3538 }
0x1cd3   :  { %3429 = vmatmul.mubr.msk.f32.vlgmr.msra.gmra.mrb[32].mxu0 %vm13_vm1, %v3539_v43 }
0x1cd4   :  { %3437 = vmatpush3.msra.mxu0 %v3604_v4  ;;  %3438 = vmatprep.mubr.msk.f32.mxu0 %vm3579_vm0, %v3578_v1 }
0x1cd5   :  { %3446 = vmatprep.subr.mxu0 %v3578_v1 }
0x1da6   :  { %v2561_v44 = vpop.f32.mrb[32].mxu0 }
0x1da7   :  { %3540 = vrcp.f32 %v2561_v44  ;;  %v3430_v45 = vpop.f32.mrb[33].mxu0 }
0x1db1   :  { %v3541_v46 = vpop.eup %3540 }
0x1db2   :  { %3434 = vmatmul.mubr.msk.f32.vlgmr.msra.gmra.mrb[34].mxu1 %vm13_vm1, %v3541_v46 }
0x1db3   :  { %3442 = vmatpush3.xpose.msk.msra.mxu1 %vm13_vm1, %v3604_v4  ;;  %3443 = vmatprep.mubr.msk.f32.mxu1 %vm3579_vm0, %v3578_v1 }
0x1db4   :  { %3451 = vmatprep.subr.mxu1 %v3578_v1 }
0x1e85   :  { %v2636_v47 = vpop.f32.mrb[34].mxu1 }
0x1e86   :  { %3542 = vrcp.f32 %v2636_v47  ;;  %v3435_v48 = vpop.f32.mrb[35].mxu1 }
0x1e90   :  { %v3543_v49 = vpop.eup %3542 }
0x1e91   :  { %3439 = vmatmul.mubr.msk.f32.vlgmr.msra.gmra.mrb[34].mxu0 %vm13_vm1, %v3543_v49 }
0x1e92   :  { %3447 = vmatpush3.msra.mxu0 %v3604_v4  ;;  %3448 = vmatprep.mubr.msk.f32.mxu0 %vm3579_vm0, %v3578_v1 }
0x1e93   :  { %3456 = vmatprep.subr.mxu0 %v3578_v1 }
0x1f64   :  { %v2711_v50 = vpop.f32.mrb[34].mxu0 }
0x1f65   :  { %3544 = vrcp.f32 %v2711_v50  ;;  %v3440_v51 = vpop.f32.mrb[35].mxu0 }
0x1f6f   :  { %v3545_v52 = vpop.eup %3544 }
0x1f70   :  { %3444 = vmatmul.mubr.msk.f32.vlgmr.msra.gmra.mrb[36].mxu1 %vm13_vm1, %v3545_v52 }
0x1f71   :  { %3452 = vmatpush3.xpose.msk.msra.mxu1 %vm13_vm1, %v3604_v4  ;;  %3453 = vmatprep.mubr.msk.f32.mxu1 %vm3579_vm0, %v3578_v1 }
0x1f72   :  { %3461 = vmatprep.subr.mxu1 %v3578_v1 }
0x2043   :  { %v2786_v53 = vpop.f32.mrb[36].mxu1 }
0x2044   :  { %3546 = vrcp.f32 %v2786_v53  ;;  %v3445_v54 = vpop.f32.mrb[37].mxu1 }
0x204e   :  { %v3547_v55 = vpop.eup %3546 }
0x204f   :  { %3449 = vmatmul.mubr.msk.f32.vlgmr.msra.gmra.mrb[36].mxu0 %vm13_vm1, %v3547_v55 }
0x2050   :  { %3457 = vmatpush3.msra.mxu0 %v3604_v4  ;;  %3458 = vmatprep.mubr.msk.f32.mxu0 %vm3579_vm0, %v3578_v1 }
0x2122   :  { %v2861_v56 = vpop.f32.mrb[36].mxu0 }
0x2123   :  { %3548 = vrcp.f32 %v2861_v56  ;;  %v3450_v57 = vpop.f32.mrb[37].mxu0 }
0x212d   :  { %v3549_v58 = vpop.eup %3548 }
0x212e   :  { %3454 = vmatmul.mubr.msk.f32.vlgmr.msra.gmra.mrb[38].mxu1 %vm13_vm1, %v3549_v58 }
0x212f   :  { %3463 = vmatprep.mubr.msk.f32.mxu1 %vm3579_vm0, %v3578_v1  ;;  %3462 = vmatpush3.msra.mxu1 %v3017_v59 }
0x2201   :  { %v2936_v60 = vpop.f32.mrb[38].mxu1 }
0x2202   :  { %3550 = vrcp.f32 %v2936_v60  ;;  %v3455_v61 = vpop.f32.mrb[39].mxu1 }
0x220c   :  { %v3551_v62 = vpop.eup %3550 }
0x220d   :  { %3459 = vmatmul.mubr.msk.f32.vlgmr.msra.gmra.mrb[38].mxu0 %vm13_vm1, %v3551_v62  ;;  %3464 = vmatmul.mubr.msk.f32.vlgmr.msra.gmra.mrb[40].mxu1 %vm13_vm1, %v3551_v62 }
0x22e0   :  { %v3011_v63 = vpop.f32.mrb[38].mxu0  ;;  %v3084_v2 = vpop.f32.mrb[40].mxu1 }
0x22e1   :  { %3552 = vrcp.f32 %v3011_v63  ;;  %v3460_v3 = vpop.f32.mrb[39].mxu0  ;;  %v3465_v5 = vpop.f32.mrb[41].mxu1 }
0x22eb   :  { %v3553_v6 = vpop.eup %3552 }
0x22ec   :  { %v3088_v1 = vmul.f32 %v3553_v6, %v3084_v2 }
0x22ee   :  { %v3090_v7 = vsel %vm3089_vm2, %v3088_v1, 0.0 }
0x22ef   :  { %3091 = vadd.xlane.f32.xlu0 %v3090_v7 }
0x237c   :  { %v3092_v0 = vpop.xlane.xlu0 %3091 }
0x237d   :  { %v3093_v4 = vrot.slane %v3092_v0, 4 }
0x237f   :  { %v3094_v8 = vadd.f32 %v3093_v4, %v3092_v0 }
0x2381   :  { %v3095_v9 = vrot.slane %v3094_v8, 2 }
0x2383   :  { %v3096_v10 = vadd.f32 %v3095_v9, %v3094_v8 }
0x2385   :  { %v3097_v11 = vrot.slane %v3096_v10, 1 }
0x2387   :  { %v3098_v12 = vadd.f32 %v3097_v11, %v3096_v10 }
0x2389   :  { %3466 = vpush %v3098_v12 }
0x23ba   :  { %s3467_s9 = spop %3466 }
0x23bb   :  { %v3100_v13 = vstv %s3467_s9 }
0x23bc   :  { %v3101_v14 = vmul.f32 0.001, %v3100_v13 }
0x23be   :  { %3103 = vst.msk [vmem:[#allocation2] sm:$0x1] %vm3102_vm3, %v3101_v14 }
0x23bf   :  { %3565 = shalt.err (!%p3562_p4)
}
0x23c0   :  { %s3566_s14 = scalar_lea.hbm %s3839_s1, 16 }
0x23c1   :  { %p3567_p5 = scmp.ne.s32.totalorder %s3839_s1, %s3566_s14  ;;  %p3570_p6 = scmp.lt.u32.totalorder %s3566_s14, %s3839_s1 }
0x23c3   :  { %p3572_p7 = pnand %p3570_p6, %p3567_p5 }
0x23c5   :  { %3575 = shalt.err (!%p3572_p7)
}
0x23c6   :  { %3113 = dma.vmem_to_hbm [thread:$0]  %s3111_s8, 16, %s3839_s1, [#allocation3]  }
0x23c7   :  { %3576 = dma.done.wait [#allocation3], 16  }
0x23c8   :  { %3577 = vsyncadd [#allocation3], 4294967280 }
0x23c9   :  { %3117 = vsyncpa [#allocation3], 1 }

</bundles_post_ra>
